<compile_context>
chip_gen: v5e
topology: v5e:2x2
jax: 0.10.0
libtpu: 0.0.40
codegen_flags: <defaults>
</compile_context>

<pallas_src>
import jax
import jax.numpy as jnp
from jax.experimental import pallas as pl
from jax.experimental.pallas import tpu as pltpu


# ---------------------------------------------------------------------------
# Kernels
# ---------------------------------------------------------------------------
def _gaussian_kernel(d_ref, off_ref, eta_ref, o_ref):
    # d_ref:   (TILE_N, 1)      distances for this row tile
    # off_ref: (1, G_pad)       gaussian centers (lane axis)
    # eta_ref: (1, G_pad)       -0.5 / width^2   (sign pre-folded)
    # o_ref:   (TILE_N, G_pad)
    diff = d_ref[...] - off_ref[...]          # (TILE_N, G_pad)
    o_ref[...] = jnp.exp(eta_ref[...] * diff * diff)


def _gaussian_kernel_centered(d_ref, eta_ref, o_ref):
    # centered variant: diff = distances (offsets unused, so not passed in)
    d = d_ref[...]                            # (TILE_N, 1)
    o_ref[...] = jnp.exp(eta_ref[...] * (d * d))


# ---------------------------------------------------------------------------
# Wrapper
# ---------------------------------------------------------------------------
def gaussian_filter_pallas(distances, offsets, widths, centered=False, tile_n=8192):
    """distances: (B, At, Nbr) -> (B, At, Nbr, G) float32 gaussian features."""
    B, At, Nbr = distances.shape
    G = offsets.shape[0]
    N = B * At * Nbr

    # ---- lane-dense feature axis: pad G up to a multiple of 128 ------------
    G_pad = max(128, ((G + 127) // 128) * 128)

    offsets_f = offsets.astype(jnp.float32)
    widths_f = widths.astype(jnp.float32)
    if centered:
        eta = -0.5 / (offsets_f * offsets_f)   # sign folded in on the host
    else:
        eta = -0.5 / (widths_f * widths_f)

    if G_pad > G:
        # pad with finite, non-degenerate values (copy last entry) so padded
        # lanes never produce inf/NaN (they are sliced away anyway).
        pad = G_pad - G
        eta = jnp.concatenate([eta, jnp.full((pad,), eta[-1], dtype=jnp.float32)])
        offsets_f = jnp.concatenate(
            [offsets_f, jnp.full((pad,), offsets_f[-1], dtype=jnp.float32)]
        )

    eta2 = eta.reshape(1, G_pad)
    off2 = offsets_f.reshape(1, G_pad)

    # ---- row tiling: shrink tile for small inputs, pad N to a multiple -----
    tile_n = int(tile_n)
    tile_n = max(8, min(tile_n, ((N + 7) // 8) * 8))   # multiple of 8 (sublane)
    N_pad = ((N + tile_n - 1) // tile_n) * tile_n

    d_flat = distances.reshape(N).astype(jnp.float32)
    if N_pad > N:
        d_flat = jnp.concatenate([d_flat, jnp.zeros((N_pad - N,), jnp.float32)])
    d2 = d_flat.reshape(N_pad, 1)

    grid = (N_pad // tile_n,)

    if centered:
        kernel = _gaussian_kernel_centered
        in_specs = [
            pl.BlockSpec((tile_n, 1), lambda i: (i, 0)),   # distances rows
            pl.BlockSpec((1, G_pad), lambda i: (0, 0)),    # eta (resident)
        ]
        args = (d2, eta2)
    else:
        kernel = _gaussian_kernel
        in_specs = [
            pl.BlockSpec((tile_n, 1), lambda i: (i, 0)),   # distances rows
            pl.BlockSpec((1, G_pad), lambda i: (0, 0)),    # offsets (resident)
            pl.BlockSpec((1, G_pad), lambda i: (0, 0)),    # eta (resident)
        ]
        args = (d2, off2, eta2)

    out = pl.pallas_call(
        kernel,
        out_shape=jax.ShapeDtypeStruct((N_pad, G_pad), jnp.float32),
        grid_spec=pl.GridSpec(
            grid=grid,
            in_specs=in_specs,
            out_specs=pl.BlockSpec((tile_n, G_pad), lambda i: (i, 0)),
        ),
        compiler_params=pltpu.CompilerParams(
            dimension_semantics=("parallel",),
            # generous but safe on every generation (v7x physical = 64 MiB);
            # tile_n=8192 -> 2 x 4 MiB output buffers + tiny inputs.
            vmem_limit_bytes=48 * 1024 * 1024,
        ),
    )(*args)

    return out[:N, :G].reshape(B, At, Nbr, G)


class GaussianFilterJAX:
    """Forward-pass re-implementation of GaussianFilter (params = init values)."""
    # TODO(synk): trainable nn.Parameter behaviour (gradient updates) is out of
    # scope here; offsets/widths are plain arrays used exactly as in forward().

    def __init__(self, start=0.5, stop=6.0, n_gaussian=100, centered=False):
        offsets = jnp.linspace(start, stop, n_gaussian, dtype=jnp.float32)
        widths = (offsets[1] - offsets[0]) * jnp.ones_like(offsets)
        self.offset = offsets
        self.width = widths
        self.centered = centered

    def __call__(self, distances):
        return gaussian_filter_pallas(
            distances, self.offset, self.width, centered=self.centered
        )


# ---------------------------------------------------------------------------
# Reference (pure JAX, mirrors the PyTorch code)
# ---------------------------------------------------------------------------
def _reference(distances, offsets, widths, centered=False):
    if centered:
        eta = 0.5 / offsets ** 2
        diff = distances[:, :, :, None]
    else:
        eta = 0.5 / widths ** 2
        diff = distances[:, :, :, None] - offsets[None, None, None, :]
    return jnp.exp(-eta * diff ** 2)


if __name__ == "__main__":
    key = jax.random.PRNGKey(0)
    B, At, Nbr = 2, 8, 9            # N = 144 rows (deliberately not a nice multiple)
    n_gaussian = 100

    # interatomic distances, positive values
    distances = jax.random.uniform(
        key, (B, At, Nbr), dtype=jnp.float32, minval=0.5, maxval=6.0
    )

    # non-centered (default) path
    gf = GaussianFilterJAX(start=0.5, stop=6.0, n_gaussian=n_gaussian, centered=False)
    out = jax.block_until_ready(gf(distances))
    ref = _reference(distances, gf.offset, gf.width, centered=False)
    assert out.shape == (B, At, Nbr, n_gaussian)
    assert jnp.allclose(out, ref, atol=1e-5, rtol=1e-5)
    assert bool(jnp.all(jnp.isfinite(out)))

    # centered path
    gf_c = GaussianFilterJAX(start=0.5, stop=6.0, n_gaussian=n_gaussian, centered=True)
    out_c = jax.block_until_ready(gf_c(distances))
    ref_c = _reference(distances, gf_c.offset, gf_c.width, centered=True)
    assert out_c.shape == (B, At, Nbr, n_gaussian)
    assert jnp.allclose(out_c, ref_c, atol=1e-5, rtol=1e-5)
    assert bool(jnp.all(jnp.isfinite(out_c)))

    print("KERNEL_OK")
</pallas_src>

<mosaic_0001>
module attributes {stable_mosaic.version = 11 : i64} {
  func.func @_gaussian_kernel(%arg0: i32, %arg1: memref<144x1xf32, #tpu.memory_space<vmem>>, %arg2: memref<1x128xf32, #tpu.memory_space<vmem>>, %arg3: memref<1x128xf32, #tpu.memory_space<vmem>>, %arg4: memref<144x128xf32, #tpu.memory_space<vmem>>) attributes {dimension_semantics = [#tpu.dimension_semantics<parallel>], iteration_bounds = array<i64: 1>, scalar_prefetch = 0 : i64, scratch_operands = 0 : i64, tpu.core_type = #tpu.core_type<tc>, window_params = [{transform_indices = @transform_0, window_bounds = array<i64: 144, 1>}, {pipeline_mode = #tpu.pipeline_mode<synchronous>, transform_indices = @transform_1, window_bounds = array<i64: 1, 128>}, {pipeline_mode = #tpu.pipeline_mode<synchronous>, transform_indices = @transform_2, window_bounds = array<i64: 1, 128>}, {transform_indices = @transform_3, window_bounds = array<i64: 144, 128>}]} {
    %c0 = arith.constant 0 : index
    %c0_0 = arith.constant 0 : index
    %0 = vector.load %arg1[%c0, %c0_0] : memref<144x1xf32, #tpu.memory_space<vmem>>, vector<144x1xf32>
    %c0_1 = arith.constant 0 : index
    %c0_2 = arith.constant 0 : index
    %1 = vector.load %arg2[%c0_1, %c0_2] : memref<1x128xf32, #tpu.memory_space<vmem>>, vector<1x128xf32>
    %2 = vector.broadcast %0 : vector<144x1xf32> to vector<144x128xf32>
    %3 = vector.broadcast %1 : vector<1x128xf32> to vector<144x128xf32>
    %4 = arith.subf %2, %3 : vector<144x128xf32>
    %c0_3 = arith.constant 0 : index
    %c0_4 = arith.constant 0 : index
    %5 = vector.load %arg3[%c0_3, %c0_4] : memref<1x128xf32, #tpu.memory_space<vmem>>, vector<1x128xf32>
    %6 = vector.broadcast %5 : vector<1x128xf32> to vector<144x128xf32>
    %7 = arith.mulf %6, %4 : vector<144x128xf32>
    %8 = arith.mulf %7, %4 : vector<144x128xf32>
    %9 = math.exp %8 : vector<144x128xf32>
    %c0_5 = arith.constant 0 : index
    %c0_6 = arith.constant 0 : index
    %10 = vector.load %arg4[%c0_5, %c0_6] : memref<144x128xf32, #tpu.memory_space<vmem>>, vector<144x128xf32>
    tpu.vector_store %arg4[%c0_5, %c0_6], %9 {strides = array<i32>} : memref<144x128xf32, #tpu.memory_space<vmem>>, vector<144x128xf32>,
    return
  }
  func.func @transform_0(%arg0: i32) -> (i32, i32) {
    %c0_i32 = arith.constant 0 : i32
    %c0_i32_0 = arith.constant 0 : i32
    return %arg0, %c0_i32 : i32, i32
  }
  func.func @transform_1(%arg0: i32) -> (i32, i32) {
    %c0_i32 = arith.constant 0 : i32
    %c0_i32_0 = arith.constant 0 : i32
    %c0_i32_1 = arith.constant 0 : i32
    return %c0_i32, %c0_i32_0 : i32, i32
  }
  func.func @transform_2(%arg0: i32) -> (i32, i32) {
    %c0_i32 = arith.constant 0 : i32
    %c0_i32_0 = arith.constant 0 : i32
    %c0_i32_1 = arith.constant 0 : i32
    return %c0_i32, %c0_i32_0 : i32, i32
  }
  func.func @transform_3(%arg0: i32) -> (i32, i32) {
    %c0_i32 = arith.constant 0 : i32
    %c0_i32_0 = arith.constant 0 : i32
    return %arg0, %c0_i32 : i32, i32
  }
}

</mosaic_0001>

<bundles_post_ra>
// kernel: tpu_custom_call.1
= control target key start
LH: loop header
LB: loop body
LE: loop exit
PB: predicated region body
PF: predicated region fallthrough
CT: control target
= control target key end

     0   :  { %v328_v3 = vmov 0   ;;  %s455_s0 = inlined_call_operand.vmem [shape: f32[144,1], index: 0, kind: input, shape index: {}]   ;;  %s456_s1 = inlined_call_operand.vmem [shape: f32[1,128], index: 1, kind: input, shape index: {}]   ;;  %s457_s2 = inlined_call_operand.vmem [shape: f32[1,128], index: 2, kind: input, shape index: {}]   ;;  %s458_s3 = inlined_call_operand.hbm [shape: f32[144,128], index: 3, kind: output, shape index: {}]  }
   0x1   :  { %v19_v0 = vld [vmem:[%s455_s0 + $0x20] sm:$0xff]  ;;  %v17_v1 = vld [vmem:[%s455_s0 + $0x10] sm:$0xff]  ;;  %263 = vset.pattern.permute.xlu2 %v328_v3  ;;  %262 = vset.pattern.permute.xlu1 %v328_v3 }
   0x2   :  { %v15_v2 = vld [vmem:[%s455_s0] sm:$0xff]  ;;  %261 = vset.pattern.permute.xlu0 %v328_v3  ;;  %56 = vperm.xlu2 %263, %v19_v0  }
   0x3   :  { %46 = vperm.xlu1 %262, %v17_v1   ;;  %36 = vperm.xlu0 %261, %v15_v2  }
   0x4   :  { %8 = vsyncpa [#allocation3], 0  ;;  %v20_v4 = vld [vmem:[%s455_s0 + $0x28] sm:$0xff]  ;;  %v18_v5 = vld [vmem:[%s455_s0 + $0x18] sm:$0xff]  ;;  %s245_s26 = sshll.u32 %s458_s3, 4  ;;  %s330_s27 = smov 128   ;;  %s246_s26 = int_to_ptr.hbm [resolvable:$true] %s245_s26 }
   0x5   :  { %v16_v6 = vld [vmem:[%s455_s0 + $0x8] sm:$0xff]  ;;  %v23_v7 = vld [vmem:[%s455_s0 + $0x40] sm:$0xff]  ;;  %v22_v8 = vld [vmem:[%s455_s0 + $0x38] sm:$0xff]  ;;  %s331_s28 = smov 8  }
   0x6   :  { %v21_v9 = vld [vmem:[%s455_s0 + $0x30] sm:$0xff]  ;;  %v26_v10 = vld [vmem:[%s455_s0 + $0x58] sm:$0xff]  ;;  %v24_v12 = vld [vmem:[%s455_s0 + $0x48] sm:$0xff] }
   0x7   :  { %v25_v11 = vld [vmem:[%s455_s0 + $0x50] sm:$0xff]  ;;  %v28_v14 = vld [vmem:[%s455_s0 + $0x68] sm:$0xff]  ;;  %v27_v15 = vld [vmem:[%s455_s0 + $0x60] sm:$0xff] }
   0x8   :  { %v29_v13 = vld [vmem:[%s455_s0 + $0x70] sm:$0xff]  ;;  %v32_v16 = vld [vmem:[%s455_s0 + $0x88] sm:$0xff]  ;;  %v31_v17 = vld [vmem:[%s455_s0 + $0x80] sm:$0xff] }
   0x9   :  { %v30_v18 = vld [vmem:[%s455_s0 + $0x78] sm:$0xff]  ;;  %v409_v19 = vld [vmem:[%s456_s1] ss:$0 sm:$0xff]  ;;  %s329_s0 = smov [#allocation2]  }
   0xa   :  { %61 = vperm.xlu2 %263, %v20_v4   ;;  %v414_v20 = vld [vmem:[%s457_s2] ss:$0 sm:$0xff]  ;;  %s243_s1 = sshll.u32 %s329_s0, 4  ;;  %s244_s1 = int_to_ptr.vmem [resolvable:$true] %s243_s1 }
   0xb   :  { %51 = vperm.xlu1 %262, %v18_v5   ;;  %41 = vperm.xlu0 %261, %v16_v6  }
  0x12   :  { %76 = vperm.xlu2 %263, %v23_v7  }
  0x13   :  { %71 = vperm.xlu1 %262, %v22_v8   ;;  %66 = vperm.xlu0 %261, %v21_v9  }
  0x1a   :  { %91 = vperm.xlu2 %263, %v26_v10  }
  0x1b   :  { %86 = vperm.xlu1 %262, %v25_v11   ;;  %81 = vperm.xlu0 %261, %v24_v12  }
  0x22   :  { %106 = vperm.xlu2 %263, %v29_v13  }
  0x23   :  { %101 = vperm.xlu1 %262, %v28_v14   ;;  %96 = vperm.xlu0 %261, %v27_v15  }
  0x2a   :  { %121 = vperm.xlu2 %263, %v32_v16  }
  0x2b   :  { %116 = vperm.xlu1 %262, %v31_v17   ;;  %111 = vperm.xlu0 %261, %v30_v18  }
  0x5c   :  { %v57_v21 = vpop.permute.xlu2 %56 }
  0x5d   :  { %v131_v22 = vsub.f32 %v57_v21, %v409_v19 }
  0x5f   :  { %v153_v23 = vmul.f32 %v414_v20, %v131_v22 }
  0x61   :  { %v171_v24 = vmul.f32 %v153_v23, %v131_v22 }
  0x63   :  { %v193_v25 = vmul.f32 1.442695, %v171_v24 }
  0x64   :  { %v62_v26 = vpop.permute.xlu2 %61 }
  0x65   :  { %266 = vpow2.f32 %v193_v25  ;;  %v132_v27 = vsub.f32 %v62_v26, %v409_v19 }
  0x67   :  { %v154_v28 = vmul.f32 %v414_v20, %v132_v27 }
  0x69   :  { %v172_v29 = vmul.f32 %v154_v28, %v132_v27 }
  0x6b   :  { %v267_v30 = vpop.eup %266  ;;  %v195_v31 = vmul.f32 1.442695, %v172_v29 }
  0x6c   :  { %225 = vst [vmem:[#allocation2 + $0x20] sm:$0xff] %v267_v30  ;;  %v77_v32 = vpop.permute.xlu2 %76 }
  0x6d   :  { %268 = vpow2.f32 %v195_v31  ;;  %v135_v33 = vsub.f32 %v77_v32, %v409_v19 }
  0x6f   :  { %v157_v34 = vmul.f32 %v414_v20, %v135_v33 }
  0x71   :  { %v175_v35 = vmul.f32 %v157_v34, %v135_v33 }
  0x73   :  { %v269_v36 = vpop.eup %268  ;;  %v201_v37 = vmul.f32 1.442695, %v175_v35 }
  0x74   :  { %226 = vst [vmem:[#allocation2 + $0x28] sm:$0xff] %v269_v36  ;;  %v92_v38 = vpop.permute.xlu2 %91 }
  0x75   :  { %270 = vpow2.f32 %v201_v37  ;;  %v138_v39 = vsub.f32 %v92_v38, %v409_v19  ;;  %v47_v40 = vpop.permute.xlu1 %46  ;;  %v37_v41 = vpop.permute.xlu0 %36 }
  0x76   :  { %v129_v42 = vsub.f32 %v47_v40, %v409_v19  ;;  %v127_v43 = vsub.f32 %v37_v41, %v409_v19 }
  0x77   :  { %v160_v44 = vmul.f32 %v414_v20, %v138_v39 }
  0x78   :  { %v151_v45 = vmul.f32 %v414_v20, %v129_v42  ;;  %v149_v46 = vmul.f32 %v414_v20, %v127_v43 }
  0x79   :  { %v178_v47 = vmul.f32 %v160_v44, %v138_v39 }
  0x7a   :  { %v169_v48 = vmul.f32 %v151_v45, %v129_v42  ;;  %v167_v49 = vmul.f32 %v149_v46, %v127_v43 }
  0x7b   :  { %v271_v50 = vpop.eup %270  ;;  %v207_v51 = vmul.f32 1.442695, %v178_v47 }
  0x7c   :  { %229 = vst [vmem:[#allocation2 + $0x40] sm:$0xff] %v271_v50  ;;  %v189_v52 = vmul.f32 1.442695, %v169_v48  ;;  %v185_v53 = vmul.f32 1.442695, %v167_v49  ;;  %v107_v54 = vpop.permute.xlu2 %106 }
  0x7d   :  { %272 = vpow2.f32 %v207_v51  ;;  %v141_v55 = vsub.f32 %v107_v54, %v409_v19  ;;  %v52_v56 = vpop.permute.xlu1 %51  ;;  %v42_v57 = vpop.permute.xlu0 %41 }
  0x7e   :  { %274 = vpow2.f32 %v189_v52  ;;  %v130_v58 = vsub.f32 %v52_v56, %v409_v19  ;;  %v128_v59 = vsub.f32 %v42_v57, %v409_v19 }
  0x7f   :  { %276 = vpow2.f32 %v185_v53  ;;  %v163_v60 = vmul.f32 %v414_v20, %v141_v55 }
  0x80   :  { %v152_v61 = vmul.f32 %v414_v20, %v130_v58  ;;  %v150_v62 = vmul.f32 %v414_v20, %v128_v59 }
  0x81   :  { %v181_v63 = vmul.f32 %v163_v60, %v141_v55 }
  0x82   :  { %v170_v0 = vmul.f32 %v152_v61, %v130_v58  ;;  %v168_v1 = vmul.f32 %v150_v62, %v128_v59 }
  0x83   :  { %v273_v2 = vpop.eup %272  ;;  %v213_v3 = vmul.f32 1.442695, %v181_v63 }
  0x84   :  { %v275_v4 = vpop.eup %274  ;;  %232 = vst [vmem:[#allocation2 + $0x58] sm:$0xff] %v273_v2  ;;  %v191_v5 = vmul.f32 1.442695, %v170_v0  ;;  %v187_v6 = vmul.f32 1.442695, %v168_v1  ;;  %v122_v7 = vpop.permute.xlu2 %121 }
  0x85   :  { %v277_v8 = vpop.eup %276  ;;  %223 = vst [vmem:[#allocation2 + $0x10] sm:$0xff] %v275_v4  ;;  %278 = vpow2.f32 %v213_v3  ;;  %v144_v9 = vsub.f32 %v122_v7, %v409_v19  ;;  %v72_v10 = vpop.permute.xlu1 %71 }
  0x86   :  { %v67_v11 = vpop.permute.xlu0 %66  ;;  %221 = vst [vmem:[#allocation2] sm:$0xff] %v277_v8  ;;  %280 = vpow2.f32 %v191_v5  ;;  %v134_v12 = vsub.f32 %v72_v10, %v409_v19 }
  0x87   :  { %v133_v13 = vsub.f32 %v67_v11, %v409_v19  ;;  %282 = vpow2.f32 %v187_v6  ;;  %v166_v14 = vmul.f32 %v414_v20, %v144_v9 }
  0x88   :  { %v156_v15 = vmul.f32 %v414_v20, %v134_v12 }
  0x89   :  { %v155_v16 = vmul.f32 %v414_v20, %v133_v13  ;;  %v184_v17 = vmul.f32 %v166_v14, %v144_v9 }
  0x8a   :  { %v174_v18 = vmul.f32 %v156_v15, %v134_v12 }
  0x8b   :  { %v173_v21 = vmul.f32 %v155_v16, %v133_v13  ;;  %v279_v22 = vpop.eup %278  ;;  %v219_v23 = vmul.f32 1.442695, %v184_v17 }
  0x8c   :  { %v281_v24 = vpop.eup %280  ;;  %235 = vst [vmem:[#allocation2 + $0x70] sm:$0xff] %v279_v22  ;;  %v199_v25 = vmul.f32 1.442695, %v174_v18 }
  0x8d   :  { %v197_v26 = vmul.f32 1.442695, %v173_v21  ;;  %v283_v27 = vpop.eup %282  ;;  %224 = vst [vmem:[#allocation2 + $0x18] sm:$0xff] %v281_v24  ;;  %284 = vpow2.f32 %v219_v23  ;;  %v87_v28 = vpop.permute.xlu1 %86 }
  0x8e   :  { %v82_v29 = vpop.permute.xlu0 %81  ;;  %222 = vst [vmem:[#allocation2 + $0x8] sm:$0xff] %v283_v27  ;;  %286 = vpow2.f32 %v199_v25  ;;  %v137_v30 = vsub.f32 %v87_v28, %v409_v19 }
  0x8f   :  { %v136_v31 = vsub.f32 %v82_v29, %v409_v19  ;;  %288 = vpow2.f32 %v197_v26 }
  0x90   :  { %v159_v32 = vmul.f32 %v414_v20, %v137_v30 }
  0x91   :  { %v158_v33 = vmul.f32 %v414_v20, %v136_v31 }
  0x92   :  { %v177_v34 = vmul.f32 %v159_v32, %v137_v30 }
  0x93   :  { %v176_v35 = vmul.f32 %v158_v33, %v136_v31  ;;  %v285_v36 = vpop.eup %284 }
  0x94   :  { %v287_v37 = vpop.eup %286  ;;  %238 = vst [vmem:[#allocation2 + $0x88] sm:$0xff] %v285_v36  ;;  %v205_v38 = vmul.f32 1.442695, %v177_v34 }
  0x95   :  { %v203_v39 = vmul.f32 1.442695, %v176_v35  ;;  %v289_v40 = vpop.eup %288  ;;  %228 = vst [vmem:[#allocation2 + $0x38] sm:$0xff] %v287_v37  ;;  %v102_v41 = vpop.permute.xlu1 %101 }
  0x96   :  { %v97_v42 = vpop.permute.xlu0 %96  ;;  %227 = vst [vmem:[#allocation2 + $0x30] sm:$0xff] %v289_v40  ;;  %290 = vpow2.f32 %v205_v38  ;;  %v140_v43 = vsub.f32 %v102_v41, %v409_v19 }
  0x97   :  { %v139_v44 = vsub.f32 %v97_v42, %v409_v19  ;;  %292 = vpow2.f32 %v203_v39 }
  0x98   :  { %v162_v45 = vmul.f32 %v414_v20, %v140_v43 }
  0x99   :  { %v161_v46 = vmul.f32 %v414_v20, %v139_v44 }
  0x9a   :  { %v180_v47 = vmul.f32 %v162_v45, %v140_v43 }
  0x9b   :  { %v179_v48 = vmul.f32 %v161_v46, %v139_v44 }
  0x9c   :  { %v291_v49 = vpop.eup %290  ;;  %v211_v50 = vmul.f32 1.442695, %v180_v47 }
  0x9d   :  { %v209_v51 = vmul.f32 1.442695, %v179_v48  ;;  %v293_v52 = vpop.eup %292  ;;  %231 = vst [vmem:[#allocation2 + $0x50] sm:$0xff] %v291_v49  ;;  %v117_v53 = vpop.permute.xlu1 %116 }
  0x9e   :  { %v112_v54 = vpop.permute.xlu0 %111  ;;  %230 = vst [vmem:[#allocation2 + $0x48] sm:$0xff] %v293_v52  ;;  %294 = vpow2.f32 %v211_v50  ;;  %v143_v55 = vsub.f32 %v117_v53, %v409_v19 }
  0x9f   :  { %v142_v56 = vsub.f32 %v112_v54, %v409_v19  ;;  %296 = vpow2.f32 %v209_v51 }
  0xa0   :  { %v165_v57 = vmul.f32 %v414_v20, %v143_v55 }
  0xa1   :  { %v164_v58 = vmul.f32 %v414_v20, %v142_v56 }
  0xa2   :  { %v183_v59 = vmul.f32 %v165_v57, %v143_v55 }
  0xa3   :  { %v182_v60 = vmul.f32 %v164_v58, %v142_v56 }
  0xa4   :  { %v295_v61 = vpop.eup %294  ;;  %v217_v62 = vmul.f32 1.442695, %v183_v59 }
  0xa5   :  { %v215_v63 = vmul.f32 1.442695, %v182_v60  ;;  %v297_v0 = vpop.eup %296  ;;  %234 = vst [vmem:[#allocation2 + $0x68] sm:$0xff] %v295_v61 }
  0xa6   :  { %233 = vst [vmem:[#allocation2 + $0x60] sm:$0xff] %v297_v0  ;;  %298 = vpow2.f32 %v217_v62 }
  0xa7   :  { %300 = vpow2.f32 %v215_v63 }
  0xac   :  { %v299_v19 = vpop.eup %298 }
  0xad   :  { %v301_v20 = vpop.eup %300  ;;  %237 = vst [vmem:[#allocation2 + $0x80] sm:$0xff] %v299_v19 }
  0xae   :  { %236 = vst [vmem:[#allocation2 + $0x78] sm:$0xff] %v301_v20 }
  0xaf   :  { %251 = dma.vmem_to_hbm [thread:$0]  %s244_s1, 2304, %s246_s26, [#allocation3], %s330_s27, %s330_s27, %s331_s28  }
  0xb0   :  { %326 = dma.done.wait [#allocation3], 2304  }
  0xb1   :  { %327 = vsyncadd [#allocation3], 4294964992 }
  0xb2   :  { %256 = vsyncpa [#allocation3], 1 }

</bundles_post_ra>
